<compile_context>
chip_gen: v5e
topology: v5e:2x2
jax: 0.10.0
libtpu: 0.0.40
codegen_flags: <defaults>
</compile_context>

<pallas_src>
import jax
import jax.numpy as jnp
from jax.experimental import pallas as pl
from jax.experimental.pallas import tpu as pltpu


def _round_up(x: int, m: int) -> int:
    return ((x + m - 1) // m) * m


def _vmem_capacity_bytes() -> int:
    """Physical VMEM of the current chip; conservative (v7x-sized) fallback."""
    try:
        info = pltpu.get_tpu_info()
        cap = int(getattr(info, "vmem_capacity_bytes", 0))
        if cap > 0:
            return cap
    except Exception:
        pass
    return 64 * 1024 * 1024


# ----------------------------------------------------------------------------
# Kernels
# ----------------------------------------------------------------------------
def _linear_single_kernel(x_ref, w_ref, b_ref, o_ref):
    # Whole problem in one VMEM block: x (B, K), w (K, N), b (1, N) -> o (B, N).
    o_ref[...] = (
        jnp.dot(x_ref[...], w_ref[...], preferred_element_type=jnp.float32)
        + b_ref[...]
    ).astype(o_ref.dtype)


def _linear_tiled_kernel(x_ref, w_ref, b_ref, o_ref):
    # x_ref: (tm, tk)  w_ref: (tk, tn)  b_ref: (1, tn)  o_ref: (tm, tn) f32.
    # Output block is resident across the K grid axis (index_map ignores k),
    # so we accumulate directly into it -- no scratch accumulator needed.
    k = pl.program_id(2)

    @pl.when(k == 0)
    def _():
        # Bias-init the output block; folds the bias add into the zero-init.
        o_ref[...] = jnp.broadcast_to(b_ref[...], o_ref.shape).astype(o_ref.dtype)

    o_ref[...] += jnp.dot(
        x_ref[...], w_ref[...], preferred_element_type=jnp.float32
    ).astype(o_ref.dtype)


# ----------------------------------------------------------------------------
# Parameter prep (one-time cost; const-folded under jit for constant params)
# ----------------------------------------------------------------------------
def _prepare_params(weight, bias, Kp, Np):
    """Transpose PyTorch-layout (out, in) weight to MXU-native (in, out) and
    zero-pad weight/bias to the tile grid. Do this once, outside the hot loop."""
    K, N = weight.shape[1], weight.shape[0]
    w_t = weight.T  # (K, N)
    if (Kp, Np) != (K, N):
        w_t = jnp.pad(w_t, ((0, Kp - K), (0, Np - N)))
    b2 = bias.reshape(1, N)
    if Np != N:
        b2 = jnp.pad(b2, ((0, 0), (0, Np - N)))
    return w_t, b2


# ----------------------------------------------------------------------------
# Forward
# ----------------------------------------------------------------------------
_SINGLE_BLOCK_BYTE_LIMIT = 8 * 1024 * 1024  # comfortably fits VMEM on all gens


def linear_regression_forward(x, weight, bias):
    """y = x @ weight.T + bias  (nn.Linear forward).

    x:      (B, in_dims)        float32
    weight: (out_dims, in_dims) float32  (PyTorch nn.Linear layout)
    bias:   (out_dims,)         float32
    """
    B, K = x.shape
    N = weight.shape[0]
    itemsize = jnp.dtype(x.dtype).itemsize

    # ---- Single-block fast path: no padding, no grid, no output slice. ------
    total_bytes = itemsize * (B * K + K * N + B * N + N)
    if total_bytes <= _SINGLE_BLOCK_BYTE_LIMIT:
        w_t = weight.T            # one-time layout change (MXU-native (K, N))
        b2 = bias.reshape(1, N)
        return pl.pallas_call(
            _linear_single_kernel,
            out_shape=jax.ShapeDtypeStruct((B, N), x.dtype),
        )(x, w_t, b2)

    # ---- Tiled path: generation-dependent tiles & VMEM budget. --------------
    vmem = _vmem_capacity_bytes()
    if vmem >= 100 * 1024 * 1024:
        # v5e / v6e: 128 MiB physical VMEM -> big tiles, raised scoped limit.
        cap_m, cap_n, cap_k = 512, 2048, 2048
        vmem_limit = 96 * 1024 * 1024
        dual_tc = False
    else:
        # v7x: 64 MiB physical VMEM, 2 TensorCores/chip.
        cap_m, cap_n, cap_k = 256, 2048, 2048
        vmem_limit = 48 * 1024 * 1024
        dual_tc = True

    tm = min(_round_up(B, 8), cap_m)
    tn = min(_round_up(N, 128), cap_n)
    tk = min(_round_up(K, 128), cap_k)

    # On v7x keep >=2 blocks along a "parallel" axis so both TCs get work.
    if dual_tc and (_round_up(B, tm) // tm) < 2 and (_round_up(N, tn) // tn) < 2:
        if _round_up(N, 128) >= 256:
            tn = _round_up(_round_up(N, 128) // 2, 128)
        elif _round_up(B, 8) >= 16:
            tm = _round_up(_round_up(B, 8) // 2, 8)

    Mp = _round_up(B, tm)
    Np = _round_up(N, tn)
    Kp = _round_up(K, tk)
    grid = (Mp // tm, Np // tn, Kp // tk)

    x_p = x if (Mp == B and Kp == K) else jnp.pad(x, ((0, Mp - B), (0, Kp - K)))
    # Weight/bias prep is a one-time cost on constant parameters.
    w_p, b_p = _prepare_params(weight, bias, Kp, Np)

    cost = pl.CostEstimate(
        flops=2 * Mp * Kp * Np,
        transcendentals=0,
        bytes_accessed=itemsize
        * (Mp * Kp * grid[1]      # x re-streamed once per N block
           + Kp * Np * grid[0]    # W re-streamed once per M block
           + Mp * Np),            # output written once
    )

    out_p = pl.pallas_call(
        _linear_tiled_kernel,
        out_shape=jax.ShapeDtypeStruct((Mp, Np), x.dtype),
        grid=grid,
        in_specs=[
            pl.BlockSpec((tm, tk), lambda i, j, k: (i, k)),   # x
            pl.BlockSpec((tk, tn), lambda i, j, k: (k, j)),   # W^T (K, N) layout
            pl.BlockSpec((1, tn), lambda i, j, k: (0, j)),    # bias
        ],
        out_specs=pl.BlockSpec((tm, tn), lambda i, j, k: (i, j)),
        compiler_params=pltpu.CompilerParams(
            dimension_semantics=("parallel", "parallel", "arbitrary"),
            vmem_limit_bytes=vmem_limit,
        ),
        cost_estimate=cost,
    )(x_p, w_p, b_p)

    if Mp == B and Np == N:
        return out_p
    return out_p[:B, :N]


if __name__ == "__main__":
    # --- Small case implied by the module (exercises the single-block path). -
    batch, in_dims, out_dims = 8, 32, 16

    key = jax.random.PRNGKey(0)
    kx, kw, kb = jax.random.split(key, 3)

    x = jax.random.normal(kx, (batch, in_dims), dtype=jnp.float32)
    bound = 1.0 / jnp.sqrt(jnp.float32(in_dims))
    weight = jax.random.uniform(kw, (out_dims, in_dims), jnp.float32, -bound, bound)
    bias = jax.random.uniform(kb, (out_dims,), jnp.float32, -bound, bound)

    y = linear_regression_forward(x, weight, bias)
    jax.block_until_ready(y)

    y_ref = x @ weight.T + bias
    assert y.shape == (batch, out_dims)
    assert jnp.allclose(y, y_ref, atol=1e-5, rtol=1e-5)

    # --- Moderate case (exercises the tiled, K-accumulating path + padding). -
    B2, K2, N2 = 500, 1777, 1000
    kx2, kw2, kb2 = jax.random.split(jax.random.PRNGKey(1), 3)
    x2 = jax.random.normal(kx2, (B2, K2), dtype=jnp.float32)
    bound2 = 1.0 / jnp.sqrt(jnp.float32(K2))
    w2 = jax.random.uniform(kw2, (N2, K2), jnp.float32, -bound2, bound2)
    b2 = jax.random.uniform(kb2, (N2,), jnp.float32, -bound2, bound2)

    y2 = linear_regression_forward(x2, w2, b2)
    jax.block_until_ready(y2)

    y2_ref = jnp.dot(x2, w2.T, precision=jax.lax.Precision.HIGHEST) + b2
    assert y2.shape == (B2, N2)
    assert jnp.allclose(y2, y2_ref, atol=1e-3, rtol=1e-3)

    print("KERNEL_OK")
</pallas_src>

<mosaic_0001>
module attributes {stable_mosaic.version = 11 : i64} {
  func.func @_linear_single_kernel(%arg0: memref<8x32xf32, #tpu.memory_space<vmem>>, %arg1: memref<32x16xf32, #tpu.memory_space<vmem>>, %arg2: memref<1x16xf32, #tpu.memory_space<vmem>>, %arg3: memref<8x16xf32, #tpu.memory_space<vmem>>) attributes {dimension_semantics = [], scalar_prefetch = 0 : i64, scratch_operands = 0 : i64, tpu.core_type = #tpu.core_type<tc>} {
    %c0 = arith.constant 0 : index
    %c0_0 = arith.constant 0 : index
    %0 = vector.load %arg0[%c0, %c0_0] : memref<8x32xf32, #tpu.memory_space<vmem>>, vector<8x32xf32>
    %c0_1 = arith.constant 0 : index
    %c0_2 = arith.constant 0 : index
    %1 = vector.load %arg1[%c0_1, %c0_2] : memref<32x16xf32, #tpu.memory_space<vmem>>, vector<32x16xf32>
    %cst = arith.constant dense<0.000000e+00> : vector<8x16xf32>
    %2 = tpu.matmul %0, %1, %cst {dimension_numbers = #tpu.dot_dimension_numbers<[1], [0], [0], [1], [0, 0, 1, 1], [], []>} : vector<8x32xf32>, vector<32x16xf32>, vector<8x16xf32> -> vector<8x16xf32>
    %c0_3 = arith.constant 0 : index
    %c0_4 = arith.constant 0 : index
    %3 = vector.load %arg2[%c0_3, %c0_4] : memref<1x16xf32, #tpu.memory_space<vmem>>, vector<1x16xf32>
    %4 = vector.broadcast %3 : vector<1x16xf32> to vector<8x16xf32>
    %5 = arith.addf %2, %4 : vector<8x16xf32>
    %c0_5 = arith.constant 0 : index
    %c0_6 = arith.constant 0 : index
    %6 = vector.load %arg3[%c0_5, %c0_6] : memref<8x16xf32, #tpu.memory_space<vmem>>, vector<8x16xf32>
    tpu.vector_store %arg3[%c0_5, %c0_6], %5 {strides = array<i32>} : memref<8x16xf32, #tpu.memory_space<vmem>>, vector<8x16xf32>,
    return
  }
}

</mosaic_0001>

<bundles_post_ra>
// kernel: tpu_custom_call.1
= control target key start
LH: loop header
LB: loop body
LE: loop exit
PB: predicated region body
PF: predicated region fallthrough
CT: control target
= control target key end

     0   :  { %s137_s0 = inlined_call_operand.vmem [shape: f32[8,32], index: 0, kind: input, shape index: {}]   ;;  %s138_s1 = inlined_call_operand.vmem [shape: f32[32,16], index: 1, kind: input, shape index: {}]   ;;  %s139_s2 = inlined_call_operand.vmem [shape: f32[1,16], index: 2, kind: input, shape index: {}]   ;;  %s140_s3 = inlined_call_operand.hbm [shape: f32[8,16], index: 3, kind: output, shape index: {}]  }
   0x1   :  { %v19_v0 = vld [vmem:[%s138_s1 + $0x18] sm:$0xff]  ;;  %v18_v1 = vld [vmem:[%s138_s1 + $0x10] sm:$0xff]  ;;  %v17_v2 = vld [vmem:[%s138_s1 + $0x8] sm:$0xff] }
   0x2   :  { %40 = vmatpush.msra.mxu0 %v19_v0 }
   0x3   :  { %8 = vsyncpa [#allocation3], 0  ;;  %v16_v3 = vld [vmem:[%s138_s1] sm:$0xff]  ;;  %vm24_vm0 = vcmask 261120   ;;  %s95_s24 = smov [#allocation2]   ;;  %s57_s28 = sshll.u32 %s140_s3, 4  ;;  %s58_s28 = int_to_ptr.hbm [resolvable:$true] %s57_s28 }
   0x4   :  { %41 = vmatpush.msra.mxu0 %v18_v1  ;;  %v15_v4 = vld [vmem:[%s137_s0] sm:$0xff]  ;;  %s55_s25 = sshll.u32 %s95_s24, 4  ;;  %vm48_vm1 = vcmask 130048   ;;  %s56_s25 = int_to_ptr.vmem [resolvable:$true] %s55_s25 }
   0x5   :  { %v68_v5 = vld [vmem:[%s139_s2] ss:$0 sm:$0xff] }
   0x6   :  { %42 = vmatpush.msra.mxu0 %v17_v2 }
   0x8   :  { %43 = vmatpush.msra.mxu0 %v16_v3 }
   0x9   :  { %66 = vmatmul.msk.f32.vlgmr.msra.gmra.mxu0 %vm24_vm0, %v15_v4 }
  0x86   :  { %v45_v6 = vpop.f32.mrf.mxu0 }
  0x87   :  { %v46_v7 = vadd.f32 %v68_v5, %v45_v6 }
  0x89   :  { %49 = vst.msk [vmem:[#allocation2] sm:$0xff] %vm48_vm1, %v46_v7 }
  0x8a   :  { %60 = dma.vmem_to_hbm [thread:$0]  %s56_s25, 128, %s58_s28, [#allocation3]  }
  0x8b   :  { %93 = dma.done.wait [#allocation3], 128  }
  0x8c   :  { %94 = vsyncadd [#allocation3], 4294967168 }
  0x8d   :  { %65 = vsyncpa [#allocation3], 1 }

</bundles_post_ra>
